<compile_context>
chip_gen: v6e
topology: v6e:2x2x1
jax: 0.10.0
libtpu: 0.0.40
codegen_flags: <defaults>
</compile_context>

<pallas_src>
import jax
import jax.numpy as jnp
from jax.experimental import pallas as pl
from jax.experimental.pallas import tpu as pltpu

_HIDDEN = 100        # logical hidden width of fc1 (matches the PyTorch module)
_HIDDEN_PAD = 128    # padded to a full sublane/lane tile


def _disc_kernel(xyT_ref, w1_ref, b1_ref, w2_ref, b2_ref, o_ref):
    # fc1 (transposed): hT = W1 @ [x; y]^T  -> (128, TB), f32 accumulation on the MXU.
    hT = jnp.dot(w1_ref[...], xyT_ref[...], preferred_element_type=jnp.float32)
    hT = jnp.maximum(hT + b1_ref[...], 0.0)                      # bias + ReLU
    # fc2 as a K=128 MXU matmul: (1, 128) @ (128, TB) -> lane-dense (1, TB).
    out = jnp.dot(w2_ref[...], hT.astype(w2_ref.dtype),
                  preferred_element_type=jnp.float32) + b2_ref[0]
    o_ref[...] = out.astype(o_ref.dtype)


def _round_up(n, m):
    return ((n + m - 1) // m) * m


def discriminator_drgcn(x, y, w1, b1, w2, b2, *, block_b=2048,
                        compute_dtype=jnp.bfloat16):
    """Forward pass of DiscriminatorDRGCN.

    Args (PyTorch parameter layout):
      x, y: (B, n_cls) inputs.
      w1:   (100, 2*n_cls)  fc1.weight  (out_features, in_features)
      b1:   (100,)          fc1.bias
      w2:   (1, 100)        fc2.weight
      b2:   (1,)            fc2.bias
    Returns:
      (B, 1) float32 logits.
    """
    B, n_cls = x.shape
    assert y.shape == (B, n_cls)
    assert w1.shape == (_HIDDEN, 2 * n_cls)

    f32 = jnp.float32
    cdt = compute_dtype

    # --- batch tiling: batch lives on the lane axis, so tiles are multiples of 128 ---
    tb = max(128, (int(block_b) // 128) * 128)       # sanitize user-supplied block_b
    tb = min(tb, _round_up(B, 128))                   # don't exceed the padded batch
    if B > 128:                                       # keep >=2 grid steps (v7x: 2 TCs)
        tb = min(tb, _round_up((B + 1) // 2, 128))
    bp = _round_up(B, tb)

    # --- transposed, concatenated input: (2*n_cls, Bp), bf16 for single-pass MXU ---
    xyT = jnp.concatenate([x.T, y.T], axis=0).astype(cdt)        # (2*n_cls, B)
    if bp != B:
        xyT = jnp.pad(xyT, ((0, 0), (0, bp - B)))                # zero rows sliced off later

    # --- weights: pad hidden 100 -> 128 (zero pads contribute 0) ---
    pad_h = _HIDDEN_PAD - _HIDDEN
    w1p = jnp.pad(w1.astype(cdt), ((0, pad_h), (0, 0)))                       # (128, 2*n_cls)
    b1p = jnp.pad(b1.astype(f32).reshape(_HIDDEN, 1), ((0, pad_h), (0, 0)))   # (128, 1)
    w2p = jnp.pad(w2.astype(cdt).reshape(1, _HIDDEN), ((0, 0), (0, pad_h)))   # (1, 128)
    b2p = b2.astype(f32).reshape(1)                                           # SMEM scalar

    out = pl.pallas_call(
        _disc_kernel,
        out_shape=jax.ShapeDtypeStruct((1, bp), f32),
        grid=(bp // tb,),
        in_specs=[
            pl.BlockSpec((2 * n_cls, tb), lambda i: (0, i)),          # xyT tile
            pl.BlockSpec((_HIDDEN_PAD, 2 * n_cls), lambda i: (0, 0)),  # W1 (resident)
            pl.BlockSpec((_HIDDEN_PAD, 1), lambda i: (0, 0)),          # b1 (resident)
            pl.BlockSpec((1, _HIDDEN_PAD), lambda i: (0, 0)),          # w2 (resident)
            pl.BlockSpec(memory_space=pltpu.MemorySpace.SMEM),         # b2 scalar
        ],
        out_specs=pl.BlockSpec((1, tb), lambda i: (0, i)),             # lane-dense out
        compiler_params=pltpu.CompilerParams(
            dimension_semantics=("parallel",),
        ),
    )(xyT, w1p, b1p, w2p, b2p)

    # (1, bp) -> (bp, 1) is a free row-major reshape; drop padded batch rows.
    return out.reshape(bp, 1)[:B]


def _init_params(key, n_cls):
    # nn.Linear default init: U(-1/sqrt(fan_in), 1/sqrt(fan_in)) for weight and bias.
    k1, k2, k3, k4 = jax.random.split(key, 4)
    fan1 = 2 * n_cls
    lim1 = 1.0 / jnp.sqrt(jnp.float32(fan1))
    w1 = jax.random.uniform(k1, (_HIDDEN, fan1), jnp.float32, -lim1, lim1)
    b1 = jax.random.uniform(k2, (_HIDDEN,), jnp.float32, -lim1, lim1)
    lim2 = 1.0 / jnp.sqrt(jnp.float32(_HIDDEN))
    w2 = jax.random.uniform(k3, (1, _HIDDEN), jnp.float32, -lim2, lim2)
    b2 = jax.random.uniform(k4, (1,), jnp.float32, -lim2, lim2)
    return w1, b1, w2, b2


def _reference(x, y, w1, b1, w2, b2):
    xy = jnp.concatenate([x, y], axis=1)
    h = jnp.maximum(xy @ w1.T + b1, 0.0)
    return h @ w2.T + b2


if __name__ == "__main__":
    key = jax.random.PRNGKey(0)
    kx, ky, kp, kx2, ky2 = jax.random.split(key, 5)

    n_cls = 4
    w1, b1, w2, b2 = _init_params(kp, n_cls)

    # bf16 matmul inputs (f32 accumulation) => ~1e-3 relative error vs f32 reference.
    tol = dict(atol=5e-2, rtol=5e-2)

    # Case 1: tiny batch (single grid step, padded batch columns exercised).
    B = 8
    x = jax.random.normal(kx, (B, n_cls), jnp.float32)
    y = jax.random.normal(ky, (B, n_cls), jnp.float32)
    out = jax.block_until_ready(discriminator_drgcn(x, y, w1, b1, w2, b2))
    ref = _reference(x, y, w1, b1, w2, b2)
    assert out.shape == (B, 1)
    assert jnp.allclose(out, ref, **tol), (out, ref)

    # Case 2: batch not a multiple of the tile -> exercises the multi-step grid path
    # (and the >=2-grid-step cap + block_b sanitization).
    B2 = 300
    x2 = jax.random.normal(kx2, (B2, n_cls), jnp.float32)
    y2 = jax.random.normal(ky2, (B2, n_cls), jnp.float32)
    out2 = jax.block_until_ready(
        discriminator_drgcn(x2, y2, w1, b1, w2, b2, block_b=500))
    ref2 = _reference(x2, y2, w1, b1, w2, b2)
    assert out2.shape == (B2, 1)
    assert jnp.allclose(out2, ref2, **tol)

    print("KERNEL_OK")
</pallas_src>

<mosaic_0001>
module attributes {stable_mosaic.version = 11 : i64} {
  func.func @_disc_kernel(%arg0: i32, %arg1: memref<8x128xbf16, #tpu.memory_space<vmem>>, %arg2: memref<128x8xbf16, #tpu.memory_space<vmem>>, %arg3: memref<128x1xf32, #tpu.memory_space<vmem>>, %arg4: memref<1x128xbf16, #tpu.memory_space<vmem>>, %arg5: memref<1xf32, #tpu.memory_space<smem>>, %arg6: memref<1x128xf32, #tpu.memory_space<vmem>>) attributes {dimension_semantics = [#tpu.dimension_semantics<parallel>], iteration_bounds = array<i64: 1>, scalar_prefetch = 0 : i64, scratch_operands = 0 : i64, tpu.core_type = #tpu.core_type<tc>, window_params = [{transform_indices = @transform_0, window_bounds = array<i64: 8, 128>}, {pipeline_mode = #tpu.pipeline_mode<synchronous>, transform_indices = @transform_1, window_bounds = array<i64: 128, 8>}, {pipeline_mode = #tpu.pipeline_mode<synchronous>, transform_indices = @transform_2, window_bounds = array<i64: 128, 1>}, {pipeline_mode = #tpu.pipeline_mode<synchronous>, transform_indices = @transform_3, window_bounds = array<i64: 1, 128>}, {transform_indices = @transform_4, window_bounds = array<i64: 1>}, {transform_indices = @transform_5, window_bounds = array<i64: 1, 128>}]} {
    %c0 = arith.constant 0 : index
    %c0_0 = arith.constant 0 : index
    %0 = vector.load %arg2[%c0, %c0_0] : memref<128x8xbf16, #tpu.memory_space<vmem>>, vector<128x8xbf16>
    %c0_1 = arith.constant 0 : index
    %c0_2 = arith.constant 0 : index
    %1 = vector.load %arg1[%c0_1, %c0_2] : memref<8x128xbf16, #tpu.memory_space<vmem>>, vector<8x128xbf16>
    %cst = arith.constant dense<0.000000e+00> : vector<128x128xf32>
    %2 = tpu.matmul %0, %1, %cst {dimension_numbers = #tpu.dot_dimension_numbers<[1], [0], [0], [1], [0, 0, 1, 1], [], []>} : vector<128x8xbf16>, vector<8x128xbf16>, vector<128x128xf32> -> vector<128x128xf32>
    %c0_3 = arith.constant 0 : index
    %c0_4 = arith.constant 0 : index
    %3 = vector.load %arg3[%c0_3, %c0_4] : memref<128x1xf32, #tpu.memory_space<vmem>>, vector<128x1xf32>
    %4 = vector.broadcast %3 : vector<128x1xf32> to vector<128x128xf32>
    %5 = arith.addf %2, %4 : vector<128x128xf32>
    %cst_5 = arith.constant 0.000000e+00 : f32
    %6 = vector.broadcast %cst_5 : f32 to vector<128x128xf32>
    %7 = arith.maximumf %5, %6 : vector<128x128xf32>
    %c0_6 = arith.constant 0 : index
    %c0_7 = arith.constant 0 : index
    %8 = vector.load %arg4[%c0_6, %c0_7] : memref<1x128xbf16, #tpu.memory_space<vmem>>, vector<1x128xbf16>
    %9 = arith.truncf %7 : vector<128x128xf32> to vector<128x128xbf16>
    %cst_8 = arith.constant dense<0.000000e+00> : vector<1x128xf32>
    %10 = tpu.matmul %8, %9, %cst_8 {dimension_numbers = #tpu.dot_dimension_numbers<[1], [0], [0], [1], [0, 0, 1, 1], [], []>} : vector<1x128xbf16>, vector<128x128xbf16>, vector<1x128xf32> -> vector<1x128xf32>
    %c0_9 = arith.constant 0 : index
    %11 = memref.load %arg5[%c0_9] : memref<1xf32, #tpu.memory_space<smem>>
    %12 = vector.broadcast %11 : f32 to vector<1x128xf32>
    %13 = arith.addf %10, %12 : vector<1x128xf32>
    %c0_10 = arith.constant 0 : index
    %c0_11 = arith.constant 0 : index
    %14 = vector.load %arg6[%c0_10, %c0_11] : memref<1x128xf32, #tpu.memory_space<vmem>>, vector<1x128xf32>
    tpu.vector_store %arg6[%c0_10, %c0_11], %13 {strides = array<i32>} : memref<1x128xf32, #tpu.memory_space<vmem>>, vector<1x128xf32>,
    return
  }
  func.func @transform_0(%arg0: i32) -> (i32, i32) {
    %c0_i32 = arith.constant 0 : i32
    %c0_i32_0 = arith.constant 0 : i32
    return %c0_i32, %arg0 : i32, i32
  }
  func.func @transform_1(%arg0: i32) -> (i32, i32) {
    %c0_i32 = arith.constant 0 : i32
    %c0_i32_0 = arith.constant 0 : i32
    %c0_i32_1 = arith.constant 0 : i32
    return %c0_i32, %c0_i32_0 : i32, i32
  }
  func.func @transform_2(%arg0: i32) -> (i32, i32) {
    %c0_i32 = arith.constant 0 : i32
    %c0_i32_0 = arith.constant 0 : i32
    %c0_i32_1 = arith.constant 0 : i32
    return %c0_i32, %c0_i32_0 : i32, i32
  }
  func.func @transform_3(%arg0: i32) -> (i32, i32) {
    %c0_i32 = arith.constant 0 : i32
    %c0_i32_0 = arith.constant 0 : i32
    %c0_i32_1 = arith.constant 0 : i32
    return %c0_i32, %c0_i32_0 : i32, i32
  }
  func.func @transform_4(%arg0: i32) -> i32 {
    %c0_i32 = arith.constant 0 : i32
    %c0_i32_0 = arith.constant 0 : i32
    return %c0_i32 : i32
  }
  func.func @transform_5(%arg0: i32) -> (i32, i32) {
    %c0_i32 = arith.constant 0 : i32
    %c0_i32_0 = arith.constant 0 : i32
    return %c0_i32, %arg0 : i32, i32
  }
}

</mosaic_0001>

<bundles_post_ra>
// kernel: tpu_custom_call.1
= control target key start
LH: loop header
LB: loop body
LE: loop exit
PB: predicated region body
PF: predicated region fallthrough
CT: control target
= control target key end

     0   :  { %vm201_vm0 = vcmask 1043456   ;;  %vm176_vm1 = vcmask 64512   ;;  %v493_v5 = vmov 0   ;;  %s637_s0 = inlined_call_operand.vmem [shape: bf16[8,128], index: 0, kind: input, shape index: {}]   ;;  %s638_s1 = inlined_call_operand.vmem [shape: bf16[128,8], index: 1, kind: input, shape index: {}]   ;;  %s639_s2 = inlined_call_operand.vmem [shape: f32[128,1], index: 2, kind: input, shape index: {}]   ;;  %s640_s3 = inlined_call_operand.vmem [shape: bf16[1,128], index: 3, kind: input, shape index: {}]   ;;  %s641_s4 = inlined_call_operand.<no memory space> [shape: f32[1], index: 4, kind: input, shape index: {}]   ;;  %s642_s5 = inlined_call_operand.hbm [shape: f32[1,128], index: 5, kind: output, shape index: {}]  }
   0x1   :  { %v39_v0 = vld [vmem:[%s637_s0] sm:$0xf]  ;;  %v464_v3 = vld [vmem:[%s638_s1 + $0x8] sm:$0xff]   ;;  %v465_v4 = vld [vmem:[%s638_s1 + $0x10] sm:$0xff]   ;;  %461 = vset.pattern.permute.xlu0 %v493_v5  ;;  %462 = vset.pattern.permute.xlu1 %v493_v5 }
   0x2   :  { %v463_v1 = vld [vmem:[%s638_s1] sm:$0xff]   ;;  %456 = vmatprep.subr.msk.bf16.mxu0 %vm201_vm0, %v39_v0  ;;  %v203_v2 = vsel %vm201_vm0, %v39_v0, 0  ;;  %v54_v6 = vld [vmem:[%s639_s2 + $0x70] sm:$0xff]  ;;  %v466_v7 = vld [vmem:[%s638_s1 + $0x18] sm:$0xff]  }
   0x3   :  { %419 = vmatpush3.bf16.msra.mxu0 %v203_v2  ;;  %420 = vmatprep.mubr.msk.bf16.mxu0 %vm176_vm1, %v463_v1  ;;  %v52_v8 = vld [vmem:[%s639_s2 + $0x60] sm:$0xff]  ;;  %v55_v10 = vld [vmem:[%s639_s2 + $0x78] sm:$0xff]  ;;  %v53_v11 = vld [vmem:[%s639_s2 + $0x68] sm:$0xff] }
   0x4   :  { %128 = vperm.xlu0 %461, %v54_v6   ;;  %v467_v9 = vld [vmem:[%s638_s1 + $0x20] sm:$0xff]   ;;  %118 = vperm.xlu1 %462, %v52_v8   ;;  %v50_v12 = vld [vmem:[%s639_s2 + $0x50] sm:$0xff] }
   0x6   :  { %421 = vmatmul.mubr.msk.bf16.vlgmr.msra.gmra.mxu0 %vm176_vm1, %v464_v3 }
   0x7   :  { %424 = vmatprep.mubr.msk.bf16.mxu0 %vm176_vm1, %v465_v4 }
   0x8   :  { %133 = vperm.xlu0 %461, %v55_v10   ;;  %123 = vperm.xlu1 %462, %v53_v11  }
   0xe   :  { %425 = vmatmul.mubr.msk.bf16.gmra.mxu0 %vm176_vm1, %v466_v7 }
   0xf   :  { %428 = vmatprep.mubr.msk.bf16.mxu0 %vm176_vm1, %v467_v9 }
  0x10   :  { %11 = vsyncpa [#allocation4], 0  ;;  %v51_v13 = vld [vmem:[%s639_s2 + $0x58] sm:$0xff]  ;;  %v468_v14 = vld [vmem:[%s638_s1 + $0x28] sm:$0xff]   ;;  %108 = vperm.xlu0 %461, %v50_v12   ;;  %v494_v27 = vmov 0.0   ;;  %vm495_vm2 = vmmov 0  }
  0x11   :  { %v469_v15 = vld [vmem:[%s638_s1 + $0x30] sm:$0xff]   ;;  %113 = vperm.xlu1 %462, %v51_v13   ;;  %v48_v16 = vld [vmem:[%s639_s2 + $0x40] sm:$0xff]  ;;  %v49_v17 = vld [vmem:[%s639_s2 + $0x48] sm:$0xff]  ;;  %436 = vmatprep.subr.bf16.mxu1 %v494_v27  ;;  %s496_s18 = smov [#allocation3]  }
  0x12   :  { %v46_v18 = vld [vmem:[%s639_s2 + $0x30] sm:$0xff]  ;;  %v47_v19 = vld [vmem:[%s639_s2 + $0x38] sm:$0xff]  ;;  %v44_v21 = vld [vmem:[%s639_s2 + $0x20] sm:$0xff]  ;;  %452 = vmatprep.mubr.msk.bf16.mxu1 %vm495_vm2, %v494_v27  ;;  %s376_s19 = sshll.u32 %s496_s18, 4  ;;  %s377_s19 = int_to_ptr.vmem [resolvable:$true] %s376_s19 }
  0x13   :  { %v470_v20 = vld [vmem:[%s638_s1 + $0x38] sm:$0xff]   ;;  %v45_v22 = vld [vmem:[%s639_s2 + $0x28] sm:$0xff]  ;;  %v42_v23 = vld [vmem:[%s639_s2 + $0x10] sm:$0xff]  ;;  %s471_s20 = scalar_lea.vmem %s377_s19, 16  ;;  %s475_s21 = scalar_lea.vmem %s377_s19, 32 }
  0x14   :  { %98 = vperm.xlu0 %461, %v48_v16   ;;  %v43_v24 = vld [vmem:[%s639_s2 + $0x18] sm:$0xff]  ;;  %v40_v25 = vld [vmem:[%s639_s2] sm:$0xff]  ;;  %v41_v26 = vld [vmem:[%s639_s2 + $0x8] sm:$0xff]  ;;  %p472_p0 = scmp.ne.s32.totalorder %s377_s19, %s471_s20  ;;  %p476_p1 = scmp.lt.s32.totalorder %s377_s19, %s377_s19 }
  0x15   :  { %103 = vperm.xlu1 %462, %v49_v17   ;;  %p477_p2 = scmp.lt.s32.totalorder %s475_s21, %s471_s20 }
  0x16   :  { %429 = vmatmul.mubr.msk.bf16.gmra.mxu0 %vm176_vm1, %v468_v14 }
  0x17   :  { %432 = vmatprep.mubr.msk.bf16.mxu0 %vm176_vm1, %v469_v15  ;;  %p478_p3 = por %p477_p2, %p476_p1 }
  0x18   :  { %88 = vperm.xlu0 %461, %v46_v18  }
  0x19   :  { %93 = vperm.xlu1 %462, %v47_v19   ;;  %p479_p4 = pnand %p478_p3, %p472_p0 }
  0x1c   :  { %78 = vperm.xlu0 %461, %v44_v21  }
  0x1d   :  { %83 = vperm.xlu1 %462, %v45_v22  }
  0x1e   :  { %433 = vmatmul.mubr.msk.bf16.gmra.mxu0 %vm176_vm1, %v470_v20 }
  0x20   :  { %68 = vperm.xlu0 %461, %v42_v23  }
  0x21   :  { %73 = vperm.xlu1 %462, %v43_v24  }
  0x24   :  { %58 = vperm.xlu0 %461, %v40_v25  }
  0x25   :  { %63 = vperm.xlu1 %462, %v41_v26  }
  0x7f   :  { %v119_v32 = vpop.permute.xlu1 %118  ;;  %v129_v34 = vpop.permute.xlu0 %128 }
  0x83   :  { %v124_v37 = vpop.permute.xlu1 %123  ;;  %v134_v39 = vpop.permute.xlu0 %133 }
  0x8b   :  { %v109_v44 = vpop.permute.xlu0 %108 }
  0x8c   :  { %v114_v42 = vpop.permute.xlu1 %113 }
  0x8f   :  { %v99_v50 = vpop.permute.xlu0 %98 }
  0x90   :  { %v104_v47 = vpop.permute.xlu1 %103 }
  0x93   :  { %v89_v62 = vpop.permute.xlu0 %88 }
  0x94   :  { %v94_v58 = vpop.permute.xlu1 %93 }
  0x97   :  { %v79_v7 = vpop.permute.xlu0 %78 }
  0x98   :  { %v84_v4 = vpop.permute.xlu1 %83 }
  0x9b   :  { %v69_v17 = vpop.permute.xlu0 %68 }
  0x9c   :  { %v74_v13 = vpop.permute.xlu1 %73 }
  0x9f   :  { %v59_v26 = vpop.permute.xlu0 %58 }
  0xa0   :  { %v64_v23 = vpop.permute.xlu1 %63 }
  0xc6   :  { %v612_v28 = vpop.f32.mrf.mxu0 }
  0xc7   :  { %v248_v24 = vadd.f32 %v612_v28, %v69_v17 }
  0xc8   :  { %v614_v29 = vpop.f32.mrf.mxu0 }
  0xca   :  { %v423_v30 = vpop.f32.mrf.mxu0 }
  0xcb   :  { %v251_v20 = vadd.f32 %v423_v30, %v74_v13 }
  0xcc   :  { %v616_v31 = vpop.f32.mrf.mxu0 }
  0xce   :  { %v426_v33 = vpop.f32.mrf.mxu0 }
  0xcf   :  { %v264_v11 = vadd.f32 %v426_v33, %v89_v62  ;;  %v243_v33 = vadd.f32 %v616_v31, %v64_v23 }
  0xd0   :  { %v255_v35 = vpop.f32.mrf.mxu0 }
  0xd1   :  { %v308_v18 = vmax.f32 %v264_v11, 0.0  ;;  %v256_v19 = vadd.f32 %v255_v35, %v79_v7  ;;  %v240_v35 = vadd.f32 %v614_v29, %v59_v26  ;;  %v328_v29 = vstv %s641_s4 }
  0xd2   :  { %v427_v36 = vpop.f32.mrf.mxu0 }
  0xd3   :  { %v267_v8 = vadd.f32 %v427_v36, %v94_v58  ;;  %v306_v25 = vmax.f32 %v256_v19, 0.0  ;;  %v304_v36 = vmax.f32 %v248_v24, 0.0 }
  0xd4   :  { %v258_v38 = vpop.f32.mrf.mxu0 }
  0xd5   :  { %v309_v14 = vmax.f32 %v267_v8, 0.0  ;;  %v259_v15 = vadd.f32 %v258_v38, %v84_v4  ;;  %v302_v38 = vmax.f32 %v240_v35, 0.0 }
  0xd6   :  { %v430_v40 = vpop.f32.mrf.mxu0 }
  0xd7   :  { %v280_v63 = vadd.f32 %v430_v40, %v109_v44  ;;  %v322_v21 = vpack.c.bf16 %v309_v14, %v308_v18  ;;  %v307_v22 = vmax.f32 %v259_v15, 0.0 }
  0xd8   :  { %v271_v41 = vpop.f32.mrf.mxu0 }
  0xd9   :  { %v312_v5 = vmax.f32 %v280_v63, 0.0  ;;  %v272_v6 = vadd.f32 %v271_v41, %v99_v50 }
  0xda   :  { %v431_v43 = vpop.f32.mrf.mxu0 }
  0xdb   :  { %v283_v59 = vadd.f32 %v431_v43, %v114_v42  ;;  %v310_v12 = vmax.f32 %v272_v6, 0.0 }
  0xdc   :  { %v274_v45 = vpop.f32.mrf.mxu0 }
  0xdd   :  { %v313_v1 = vmax.f32 %v283_v59, 0.0  ;;  %v275_v2 = vadd.f32 %v274_v45, %v104_v47 }
  0xde   :  { %v434_v46 = vpop.f32.mrf.mxu0 }
  0xdf   :  { %v296_v49 = vadd.f32 %v434_v46, %v129_v34  ;;  %v324_v9 = vpack.c.bf16 %v313_v1, %v312_v5  ;;  %v311_v10 = vmax.f32 %v275_v2, 0.0  ;;  %v321_v34 = vpack.c.bf16 %v307_v22, %v306_v25 }
  0xe0   :  { %v287_v48 = vpop.f32.mrf.mxu0 }
  0xe1   :  { %v316_v54 = vmax.f32 %v296_v49, 0.0  ;;  %v288_v55 = vadd.f32 %v287_v48, %v119_v32  ;;  %v323_v16 = vpack.c.bf16 %v311_v10, %v310_v12  ;;  %v305_v32 = vmax.f32 %v251_v20, 0.0 }
  0xe2   :  { %v435_v51 = vpop.f32.mrf.mxu0 }
  0xe3   :  { %v299_v52 = vadd.f32 %v435_v51, %v134_v39  ;;  %v314_v0 = vmax.f32 %v288_v55, 0.0  ;;  %v320_v30 = vpack.c.bf16 %v305_v32, %v304_v36  ;;  %v318_v39 = vld [vmem:[%s640_s3] sm:$0x1] }
  0xe4   :  { %v290_v53 = vpop.f32.mrf.mxu0 }
  0xe5   :  { %v317_v56 = vmax.f32 %v299_v52, 0.0  ;;  %v291_v57 = vadd.f32 %v290_v53, %v124_v37  ;;  %v303_v37 = vmax.f32 %v243_v33, 0.0 }
  0xe7   :  { %v315_v60 = vmax.f32 %v291_v57, 0.0  ;;  %v326_v61 = vpack.c.bf16 %v317_v56, %v316_v54  ;;  %v319_v28 = vpack.c.bf16 %v303_v37, %v302_v38 }
  0xe9   :  { %437 = vmatpush3.bf16.msra.mxu1 %v326_v61  ;;  %v325_v3 = vpack.c.bf16 %v315_v60, %v314_v0 }
  0xea   :  { %438 = vmatprep.subr.bf16.mxu1 %v494_v27 }
  0xed   :  { %439 = vmatpush3.bf16.msra.mxu1 %v325_v3 }
  0xee   :  { %440 = vmatprep.subr.bf16.mxu1 %v494_v27 }
  0xf1   :  { %441 = vmatpush3.bf16.msra.mxu1 %v324_v9 }
  0xf2   :  { %442 = vmatprep.subr.bf16.mxu1 %v494_v27 }
  0xf5   :  { %443 = vmatpush3.bf16.msra.mxu1 %v323_v16 }
  0xf6   :  { %444 = vmatprep.subr.bf16.mxu1 %v494_v27 }
  0xf9   :  { %445 = vmatpush3.bf16.msra.mxu1 %v322_v21 }
  0xfa   :  { %446 = vmatprep.subr.bf16.mxu1 %v494_v27 }
  0xfd   :  { %447 = vmatpush3.bf16.msra.mxu1 %v321_v34 }
  0xfe   :  { %448 = vmatprep.subr.bf16.mxu1 %v494_v27 }
 0x101   :  { %449 = vmatpush3.bf16.msra.mxu1 %v320_v30 }
 0x102   :  { %450 = vmatprep.subr.bf16.mxu1 %v494_v27 }
 0x105   :  { %451 = vmatpush3.bf16.msra.mxu1 %v319_v28 }
 0x108   :  { %453 = vmatmul.mubr.bf16.vlgmr.msra.gmra.mxu1 %v318_v39 }
 0x1c8   :  { %v363_v31 = vpop.f32.mrf.mxu1 }
 0x1c9   :  { %v364_v40 = vadd.f32 %v363_v31, %v328_v29 }
 0x1ca   :  { %v454_v41 = vpop.f32.mrf.mxu1 }
 0x1cb   :  { %369 = vst [vmem:[#allocation3] sm:$0x1] %v364_v40 }
 0x1cc   :  { %v366_v42 = vpop.f32.mrf.mxu1 }
 0x1cd   :  { %482 = shalt.err (!%p479_p4)
}
 0x1ce   :  { %379 = dma.vmem_to_hbm [thread:$0]  %s377_s19, 16, %s642_s5, [#allocation4]   ;;  %v455_v27 = vpop.f32.mrf.mxu1 }
 0x1cf   :  { %491 = dma.done.wait [#allocation4], 16  }
 0x1d0   :  { %492 = vsyncadd [#allocation4], 4294967280 }
 0x1d1   :  { %383 = vsyncpa [#allocation4], 1 }

</bundles_post_ra>
